<compile_context>
chip_gen: v7x
topology: tpu7x:2x2x1
jax: 0.10.0
libtpu: 0.0.40
codegen_flags: <defaults>
</compile_context>

<pallas_src>
import functools

import jax
import jax.numpy as jnp
from jax.experimental import pallas as pl
from jax.experimental.pallas import tpu as pltpu


def _conv1x1_bn_relu_kernel(x_ref, w_ref, b_ref, o_ref):
    # x_ref: (1, C_in, ts)   tile of one batch image, spatial in the lane dim
    # w_ref: (C_out, C_in)   BN-scale-folded weight (constant across grid)
    # b_ref: (C_out, 1)      folded BN bias = beta - mean * scale (f32)
    # o_ref: (1, C_out, ts)
    y = jnp.dot(w_ref[...], x_ref[0], preferred_element_type=jnp.float32)
    y = y + b_ref[...]                      # f32 epilogue (v5e-safe)
    o_ref[0] = jnp.maximum(y, 0.0).astype(o_ref.dtype)


@functools.partial(jax.jit, static_argnames=("stride", "ts_max"))
def conv1x1_bn_relu(x_nchw, weight, gamma, beta, running_mean, running_var,
                    *, eps=1e-5, stride=1, ts_max=2048):
    """Forward pass of Conv1x1 (groups=1), eval-mode BatchNorm folded.

    x_nchw:  (N, C_in, H, W)
    weight:  (C_out, C_in, 1, 1)  -- PyTorch conv weight layout
    gamma, beta, running_mean, running_var: (C_out,)
    """
    N, C_in, H, W = x_nchw.shape
    C_out = weight.shape[0]

    # stride for a 1x1 conv with no padding == spatial subsampling
    if stride != 1:
        x_nchw = x_nchw[:, :, ::stride, ::stride]
        H, W = x_nchw.shape[2], x_nchw.shape[3]

    S = H * W
    x = x_nchw.reshape(N, C_in, S)          # free reshape of NCHW

    # Fold eval-mode BatchNorm: scale into weight rows, keep bias separate.
    # TODO(synk): training-mode BatchNorm (batch statistics) and groups>1 are
    # not implemented; this reproduces eval-mode (running-stats), groups=1.
    scale = gamma / jnp.sqrt(running_var + eps)                    # (C_out,)
    w = (weight.reshape(C_out, C_in) * scale[:, None]).astype(x.dtype)
    bias = (beta - running_mean * scale).reshape(C_out, 1).astype(jnp.float32)

    # Spatial (lane) tile: multiple of 128, up to ts_max; avoid padding when
    # the spatial extent already lines up.
    if S % 128 == 0 and S <= ts_max:
        ts = S
    else:
        ts = min(ts_max, pl.cdiv(S, 128) * 128)
    S_pad = pl.cdiv(S, ts) * ts
    if S_pad != S:
        x = jnp.pad(x, ((0, 0), (0, 0), (0, S_pad - S)))

    itemsize = jnp.dtype(x.dtype).itemsize

    # VMEM budget: double-buffered x/out tiles + (double-buffered) tiny weight
    # and bias blocks, plus headroom.  Clamped so it is valid on v7x (64 MiB).
    block_bytes = (2 * (C_in * ts + C_out * ts) * itemsize
                   + 2 * C_out * C_in * itemsize + 2 * C_out * 4)
    vmem_limit = int(min(max(2 * block_bytes + (4 << 20), 16 << 20), 48 << 20))

    cost = pl.CostEstimate(
        flops=2 * N * S_pad * C_in * C_out,
        transcendentals=0,
        bytes_accessed=(N * S_pad * (C_in + C_out) * itemsize
                        + C_out * C_in * itemsize + C_out * 4),
    )

    # TODO(synk): for large C_in/C_out add grid axes over C_out ("parallel")
    # and C_in ("arbitrary") with a scratch accumulator instead of pulling the
    # full weight into VMEM.
    out = pl.pallas_call(
        _conv1x1_bn_relu_kernel,
        out_shape=jax.ShapeDtypeStruct((N, C_out, S_pad), x.dtype),
        grid_spec=pltpu.PrefetchScalarGridSpec(
            num_scalar_prefetch=0,
            grid=(N, S_pad // ts),
            in_specs=[
                pl.BlockSpec((1, C_in, ts), lambda n, s: (n, 0, s)),
                pl.BlockSpec((C_out, C_in), lambda n, s: (0, 0)),
                pl.BlockSpec((C_out, 1), lambda n, s: (0, 0)),
            ],
            out_specs=pl.BlockSpec((1, C_out, ts), lambda n, s: (n, 0, s)),
        ),
        compiler_params=pltpu.CompilerParams(
            dimension_semantics=("parallel", "parallel"),
            vmem_limit_bytes=vmem_limit,
        ),
        cost_estimate=cost,
    )(x, w, bias)

    if S_pad != S:
        out = out[:, :, :S]
    return out.reshape(N, C_out, H, W)      # already NCHW, no transpose


if __name__ == "__main__":
    # Small shapes consistent with the module: batch=2, C_in=4, C_out=8, 16x16.
    N, C_in, C_out, Hsp, Wsp = 2, 4, 8, 16, 16

    key = jax.random.PRNGKey(0)
    kx, kw, kg, kb, km, kv = jax.random.split(key, 6)

    x = jax.random.normal(kx, (N, C_in, Hsp, Wsp), dtype=jnp.float32)
    weight = jax.random.normal(kw, (C_out, C_in, 1, 1), dtype=jnp.float32) * 0.1
    gamma = 1.0 + 0.1 * jax.random.normal(kg, (C_out,), dtype=jnp.float32)
    beta = 0.1 * jax.random.normal(kb, (C_out,), dtype=jnp.float32)
    running_mean = 0.1 * jax.random.normal(km, (C_out,), dtype=jnp.float32)
    running_var = jnp.abs(1.0 + 0.1 * jax.random.normal(kv, (C_out,), dtype=jnp.float32))

    out = conv1x1_bn_relu(x, weight, gamma, beta, running_mean, running_var)
    jax.block_until_ready(out)

    # Pure-JAX reference check (same folded-BN math).
    w_ref = weight.reshape(C_out, C_in)
    y_ref = jnp.einsum("nchw,oc->nohw", x, w_ref)
    s = gamma / jnp.sqrt(running_var + 1e-5)
    b = beta - running_mean * s
    y_ref = jnp.maximum(y_ref * s[None, :, None, None] + b[None, :, None, None], 0.0)
    assert out.shape == (N, C_out, Hsp, Wsp)
    assert jnp.allclose(out, y_ref, atol=1e-5, rtol=1e-5)

    print("KERNEL_OK")
</pallas_src>

<mosaic_0001>
module attributes {stable_mosaic.version = 11 : i64} {
  func.func @_conv1x1_bn_relu_kernel(%arg0: i32, %arg1: i32, %arg2: memref<1x4x256xf32, #tpu.memory_space<vmem>>, %arg3: memref<8x4xf32, #tpu.memory_space<vmem>>, %arg4: memref<8x1xf32, #tpu.memory_space<vmem>>, %arg5: memref<1x8x256xf32, #tpu.memory_space<vmem>>) attributes {dimension_semantics = [#tpu.dimension_semantics<parallel>, #tpu.dimension_semantics<parallel>], iteration_bounds = array<i64: 2, 1>, scalar_prefetch = 0 : i64, scratch_operands = 0 : i64, tpu.core_type = #tpu.core_type<tc>, window_params = [{transform_indices = @transform_0, window_bounds = array<i64: 1, 4, 256>}, {pipeline_mode = #tpu.pipeline_mode<synchronous>, transform_indices = @transform_1, window_bounds = array<i64: 8, 4>}, {pipeline_mode = #tpu.pipeline_mode<synchronous>, transform_indices = @transform_2, window_bounds = array<i64: 8, 1>}, {transform_indices = @transform_3, window_bounds = array<i64: 1, 8, 256>}]} {
    %c0 = arith.constant 0 : index
    %c0_0 = arith.constant 0 : index
    %0 = vector.load %arg3[%c0, %c0_0] : memref<8x4xf32, #tpu.memory_space<vmem>>, vector<8x4xf32>
    %c0_1 = arith.constant 0 : index
    %c0_2 = arith.constant 0 : index
    %c0_3 = arith.constant 0 : index
    %1 = vector.load %arg2[%c0_1, %c0_2, %c0_3] : memref<1x4x256xf32, #tpu.memory_space<vmem>>, vector<1x4x256xf32>
    %2 = vector.shape_cast %1 : vector<1x4x256xf32> to vector<4x256xf32>
    %cst = arith.constant dense<0.000000e+00> : vector<8x256xf32>
    %3 = tpu.matmul %0, %2, %cst {dimension_numbers = #tpu.dot_dimension_numbers<[1], [0], [0], [1], [0, 0, 1, 1], [], []>} : vector<8x4xf32>, vector<4x256xf32>, vector<8x256xf32> -> vector<8x256xf32>
    %c0_4 = arith.constant 0 : index
    %c0_5 = arith.constant 0 : index
    %4 = vector.load %arg4[%c0_4, %c0_5] : memref<8x1xf32, #tpu.memory_space<vmem>>, vector<8x1xf32>
    %5 = vector.broadcast %4 : vector<8x1xf32> to vector<8x256xf32>
    %6 = arith.addf %3, %5 : vector<8x256xf32>
    %cst_6 = arith.constant 0.000000e+00 : f32
    %7 = vector.broadcast %cst_6 : f32 to vector<8x256xf32>
    %8 = arith.maximumf %6, %7 : vector<8x256xf32>
    %c0_7 = arith.constant 0 : index
    %c0_8 = arith.constant 0 : index
    %c0_9 = arith.constant 0 : index
    %9 = vector.load %arg5[%c0_7, %c0_8, %c0_9] : memref<1x8x256xf32, #tpu.memory_space<vmem>>, vector<1x8x256xf32>
    %10 = vector.shape_cast %9 : vector<1x8x256xf32> to vector<8x256xf32>
    %11 = vector.shape_cast %8 : vector<8x256xf32> to vector<1x8x256xf32>
    tpu.vector_store %arg5[%c0_7, %c0_8, %c0_9], %11 {strides = array<i32>} : memref<1x8x256xf32, #tpu.memory_space<vmem>>, vector<1x8x256xf32>,
    return
  }
  func.func @transform_0(%arg0: i32, %arg1: i32) -> (i32, i32, i32) {
    %c0_i32 = arith.constant 0 : i32
    %c0_i32_0 = arith.constant 0 : i32
    return %arg0, %c0_i32, %arg1 : i32, i32, i32
  }
  func.func @transform_1(%arg0: i32, %arg1: i32) -> (i32, i32) {
    %c0_i32 = arith.constant 0 : i32
    %c0_i32_0 = arith.constant 0 : i32
    %c0_i32_1 = arith.constant 0 : i32
    return %c0_i32, %c0_i32_0 : i32, i32
  }
  func.func @transform_2(%arg0: i32, %arg1: i32) -> (i32, i32) {
    %c0_i32 = arith.constant 0 : i32
    %c0_i32_0 = arith.constant 0 : i32
    %c0_i32_1 = arith.constant 0 : i32
    return %c0_i32, %c0_i32_0 : i32, i32
  }
  func.func @transform_3(%arg0: i32, %arg1: i32) -> (i32, i32, i32) {
    %c0_i32 = arith.constant 0 : i32
    %c0_i32_0 = arith.constant 0 : i32
    return %arg0, %c0_i32, %arg1 : i32, i32, i32
  }
}

</mosaic_0001>

<bundles_post_ra>
// kernel: conv1x1_bn_relu.1
= control target key start
LH: loop header
LB: loop body
LE: loop exit
PB: predicated region body
PF: predicated region fallthrough
CT: control target
= control target key end

     0   :  { %s481_s12 = smov 0   ;;  %s483_s13 = smov 0   ;;  %s520_s0 = inlined_call_operand.vmem [shape: f32[2,4,256], index: 0, kind: input, shape index: {}]   ;;  %s521_s1 = inlined_call_operand.vmem [shape: f32[8,4], index: 1, kind: input, shape index: {}]   ;;  %s522_s2 = inlined_call_operand.vmem [shape: f32[8,1], index: 2, kind: input, shape index: {}]   ;;  %s523_s3 = inlined_call_operand.vmem [shape: f32[2,8,256], index: 3, kind: output, shape index: {}]  }
   0x1   :  { %s485_s14 = smov 0  }
   0x2 LB: > { %s25_s15 = sadd.s32 1, %s453_s13  ;;  %p395_p0 = scmp.ge.s32.totalorder %s457_s14, 1  ;;  %s457_s14 = sphi %s485_s14, %s13_s14   ;;  %s453_s13 = sphi %s483_s13, %s525_s13   ;;  %s449_s12 = sphi %s481_s12, %s524_s12  }
   0x3   : > { %p27_p1 = scmp.ge.s32.totalorder %s25_s15, 2  ;;  %p158_p2 = scmp.lt.s32.totalorder %s457_s14, 3 }
   0x5   : > { %s527_s15 = smov (%p27_p1, %s25_s15), 0  ;;  %p159_p3 = pnand %p395_p0, %p158_p2 }
   0x6   : > { %p191_p4 = scmp.lt.s32.totalorder (!%p159_p3), %s449_s12, 1  ;;  %v459_v0 = vmov (!%p159_p3), 0.0   ;;  %v460_v1 = vmov (!%p159_p3), 0   ;;  %v212_v2 = vld [vmem:[%s522_s2] sm:$0xff] (!%p159_p3)  ;;  %vm224_vm0 = vcmask (!%p159_p3), 1043456   ;;  %vm220_vm1 = vcmask (!%p159_p3), 31744  }
   0x7   : > { %162 = sbr.rel (%p159_p3) target bundleno = 240 (0xf0), region = 32  ;;  %293 = vmatprep.mubr.f32.mxu0 (!%p159_p3), %v459_v0  ;;  %433 = vset.pattern.permute.xlu0 (!%p159_p3), %v460_v1  ;;  %v210_v5 = vld [vmem:[%s521_s1] sm:$0xff] (!%p159_p3) }
   0x8   : > { %215 = vperm.xlu0 (!%p159_p3), %433, %v212_v2  }
   0xe   : > { %s529_s12 = smov (!%p191_p4, %s449_s12), 1 }
   0xf   : > { %s405_s18 = sshll.u32 %s529_s12, 3  ;;  %s406_s24 = sshll.u32 %s529_s12, 4 }
  0x10   : > { %s198_s21 = scalar_lea.vmem %s520_s0, %s405_s18  ;;  %s208_s27 = scalar_lea.vmem %s523_s3, %s406_s24 }
  0x11   : > { %v211_v3 = vld [vmem:[%s198_s21] sm:$0xff] }
  0x12   : > { %v219_v4 = vcombine.high %v211_v3, %v211_v3 }
  0x14   : > { %400 = vmatprep.subr.msk.mxu0 %vm224_vm0, %v219_v4 }
  0x15   : > { %401 = vmatpush1.msk.msra.mxu0 %vm224_vm0, %v211_v3 }
  0x16   : > { %402 = vmatmul.mubr.msk.f32.vlgmr.msra.gmra.mrb[0].mxu0 %vm220_vm1, %v210_v5 }
  0x87   : > { %v216_v6 = vpop.permute.xlu0 %215 }
  0xe9   : > { %v295_v7 = vpop.f32.mrb[0].mxu0 }
  0xea   : > { %v296_v8 = vadd.f32 %v295_v7, %v216_v6  ;;  %v297_v9 = vpop.f32.mrb[1].mxu0 }
  0xeb   : > { %v298_v10 = vadd.f32 %v297_v9, %v216_v6 }
  0xec   : > { %v300_v11 = vmax.f32 %v296_v8, 0.0 }
  0xed   : > { %v301_v12 = vmax.f32 %v298_v10, 0.0 }
  0xee   : > { %302 = vst [vmem:[%s208_s27] sm:$0xff] %v300_v11 }
  0xef   : > { %303 = vst [vmem:[%s208_s27 + $0x8] sm:$0xff] %v301_v12 }
  0xf0 PF: > { %s13_s14 = sadd.s32 1, %s457_s14   ;;  %s524_s12 = smov %s453_s13 }
  0xf1   : > { %p10_p5 = scmp.ge.s32.totalorder %s13_s14, 4   ;;  %s525_s13 = smov %s527_s15 }
  0xf3   :  { %12 = sbr.rel (!%p10_p5) target bundleno = 2 (0x2), region = 62 }

</bundles_post_ra>
